<compile_context>
chip_gen: v6e
topology: v6e:2x2x1
jax: 0.10.0
libtpu: 0.0.40
codegen_flags: <defaults>
</compile_context>

<pallas_src>
import math
import numpy as np
import jax
import jax.numpy as jnp
from jax import lax
from jax.experimental import pallas as pl
from jax.experimental.pallas import tpu as pltpu


# ----------------------------- Pallas kernel -------------------------------

def _lstm_decoder_kernel(lens_ref, gx_ref, whh_ref, h0_ref, c0_ref,
                         out_ref, hout_ref, cout_ref,
                         h_scr, c_scr):
    """Single-layer LSTM recurrence over one chunk of timesteps.

    Grid: (T_pad // T_CHUNK,) over the time axis ("arbitrary" — carries state).

    lens_ref : (B, 1)        int32  valid sequence length per batch element
    gx_ref   : (Tc, B, 4H)   f32    precomputed x_t @ W_ih + (b_ih + b_hh)
    whh_ref  : (H, 4H)       bf16   hidden->gates weight (pre-transposed)
    h0_ref   : (B, H)        f32    initial hidden state (from encoder)
    c0_ref   : (B, H)        f32    initial cell state (from encoder)
    out_ref  : (Tc, B, H)    f32    per-step hidden states (0 past the length)
    hout_ref : (B, H)        f32    hidden state at last valid step
    cout_ref : (B, H)        f32    cell state at last valid step
    h_scr/c_scr : (B, H) f32 scratch, persist across grid steps (the carry).
    """
    Tc, B, _ = gx_ref.shape
    H = h0_ref.shape[1]
    chunk = pl.program_id(0)

    @pl.when(chunk == 0)
    def _():
        h_scr[...] = h0_ref[...]
        c_scr[...] = c0_ref[...]

    # Hoisted out of the serial loop: weight load and the lens broadcast
    # (broadcast_in_dim is not CSE'd inside the loop).
    whh = whh_ref[...]                                         # (H, 4H) bf16
    lens_b = jnp.broadcast_to(lens_ref[...], (B, H))           # (B, H) int32
    t_base = chunk * Tc

    def step(t, carry):
        h_prev = h_scr[...]
        c_prev = c_scr[...]
        # Only the recurrent matmul is left on the serial critical path.
        gates = gx_ref[t] + jnp.dot(h_prev.astype(whh.dtype), whh,
                                    preferred_element_type=jnp.float32)
        # Full-vreg EUP ops (4H == 128 lanes), then aligned static slices.
        sig = jax.nn.sigmoid(gates)
        tnh = jnp.tanh(gates)
        i_g = sig[:, 0 * H:1 * H]
        f_g = sig[:, 1 * H:2 * H]
        g_g = tnh[:, 2 * H:3 * H]
        o_g = sig[:, 3 * H:4 * H]
        c_new = f_g * c_prev + i_g * g_g
        h_new = o_g * jnp.tanh(c_new)

        valid = (t_base + t) < lens_b          # (B, H) compare, no broadcast
        c_scr[...] = jnp.where(valid, c_new, c_prev)
        h_scr[...] = jnp.where(valid, h_new, h_prev)
        # One extra vselect on data already in vregs is cheaper than a
        # post-loop read-modify-write of the whole (Tc, B, H) output block.
        out_ref[t] = jnp.where(valid, h_new, jnp.zeros_like(h_new))
        return carry

    # Fully unrolled: gives the LLO scheduler visibility to overlap step t's
    # MXU push with step t-1's gate math.
    lax.fori_loop(0, Tc, step, 0, unroll=True)

    # Finalize the (num_layers=1) hidden/cell outputs only once.
    @pl.when(chunk == pl.num_programs(0) - 1)
    def _():
        hout_ref[...] = h_scr[...]
        cout_ref[...] = c_scr[...]


# ------------------------------- Wrapper ------------------------------------

def decoder_forward(params, y_act, y_tar, y_lens, h_enc, c_enc, t_chunk=4):
    """Mirrors Decoder.forward: returns (lstm_out, (h_out, c_out), out_lens)."""
    # Embedding lookups + concat: glue, plain JAX (gather is not the hot path).
    act_emb = jnp.take(params["action_embedding"], y_act, axis=0)   # (B,T,E)
    tar_emb = jnp.take(params["target_embedding"], y_tar, axis=0)   # (B,T,E)
    embeds = jnp.concatenate([act_emb, tar_emb], axis=2)            # (B,T,2E)

    B, T, twoE = embeds.shape
    H = h_enc.shape[-1]

    # bf16 for the MXU-bound tensors; accumulate in f32.
    x_tm = jnp.transpose(embeds, (1, 0, 2)).astype(jnp.bfloat16)    # (T,B,2E)
    wih_t = params["w_ih"].T.astype(jnp.bfloat16)                   # (2E,4H)
    whh_t = params["w_hh"].T.astype(jnp.bfloat16)                   # (H,4H)
    bias = (params["b_ih"] + params["b_hh"]).astype(jnp.float32)    # (4H,)

    # Hoisted input projection: one big (T*B, 2E) @ (2E, 4H) matmul + bias
    # instead of T tiny matmuls + broadcasts inside the recurrence.
    gx = jnp.dot(x_tm.reshape(T * B, twoE), wih_t,
                 preferred_element_type=jnp.float32)
    gx = (gx + bias[None, :]).reshape(T, B, 4 * H)                  # (T,B,4H)

    # Pad T to a multiple of the time-chunk; padded steps fall past every
    # sequence length, so the in-kernel mask freezes state and zeroes output.
    n_chunks = pl.cdiv(T, t_chunk)
    T_pad = n_chunks * t_chunk
    if T_pad != T:
        gx = jnp.pad(gx, ((0, T_pad - T), (0, 0), (0, 0)))

    h0 = h_enc.reshape(B, H).astype(jnp.float32)
    c0 = c_enc.reshape(B, H).astype(jnp.float32)
    lens = jnp.asarray(y_lens, dtype=jnp.int32).reshape(B, 1)

    grid_spec = pltpu.PrefetchScalarGridSpec(
        num_scalar_prefetch=0,
        grid=(n_chunks,),
        in_specs=[
            pl.BlockSpec((B, 1), lambda i: (0, 0)),                  # lens
            pl.BlockSpec((t_chunk, B, 4 * H), lambda i: (i, 0, 0)),  # gates_x
            pl.BlockSpec((H, 4 * H), lambda i: (0, 0)),              # W_hh
            pl.BlockSpec((B, H), lambda i: (0, 0)),                  # h0
            pl.BlockSpec((B, H), lambda i: (0, 0)),                  # c0
        ],
        out_specs=(
            pl.BlockSpec((t_chunk, B, H), lambda i: (i, 0, 0)),      # out
            pl.BlockSpec((B, H), lambda i: (0, 0)),                  # h_out
            pl.BlockSpec((B, H), lambda i: (0, 0)),                  # c_out
        ),
        scratch_shapes=[pltpu.VMEM((B, H), jnp.float32),             # h carry
                        pltpu.VMEM((B, H), jnp.float32)],            # c carry
    )

    out_tm, h_out, c_out = pl.pallas_call(
        _lstm_decoder_kernel,
        out_shape=(
            jax.ShapeDtypeStruct((T_pad, B, H), jnp.float32),
            jax.ShapeDtypeStruct((B, H), jnp.float32),
            jax.ShapeDtypeStruct((B, H), jnp.float32),
        ),
        grid_spec=grid_spec,
        compiler_params=pltpu.CompilerParams(
            dimension_semantics=("arbitrary",),     # time carries the state
            vmem_limit_bytes=32 * 1024 * 1024,      # safe on v5e/v6e/v7x
        ),
    )(lens, gx, whh_t, h0, c0)

    # pad_packed_sequence pads only up to the longest length in the batch.
    # Requires host-resident y_lens (same as torch's pad_packed_sequence
    # returning a host-known max length).
    max_len = int(np.max(np.asarray(y_lens)))
    lstm_out = jnp.transpose(out_tm, (1, 0, 2))[:, :max_len, :]     # (B,L,H)
    out_lens = jnp.asarray(y_lens, dtype=jnp.int32)
    # h_out / c_out keep PyTorch's (num_layers=1, B, H) leading axis.
    return lstm_out, (h_out[None], c_out[None]), out_lens


# --------------------------- Parameter init ----------------------------------

def init_params(key, n_actions, n_targets, embedding_dim, hidden_dim):
    k1, k2, k3, k4, k5, k6 = jax.random.split(key, 6)
    act_emb = jax.random.normal(k1, (n_actions, embedding_dim), jnp.float32)
    act_emb = act_emb.at[0].set(0.0)        # padding_idx=0
    tar_emb = jax.random.normal(k2, (n_targets, embedding_dim), jnp.float32)
    tar_emb = tar_emb.at[0].set(0.0)        # padding_idx=0
    bound = 1.0 / math.sqrt(hidden_dim)     # PyTorch LSTM default init range
    w_ih = jax.random.uniform(k3, (4 * hidden_dim, 2 * embedding_dim),
                              jnp.float32, -bound, bound)
    w_hh = jax.random.uniform(k4, (4 * hidden_dim, hidden_dim),
                              jnp.float32, -bound, bound)
    b_ih = jax.random.uniform(k5, (4 * hidden_dim,), jnp.float32, -bound, bound)
    b_hh = jax.random.uniform(k6, (4 * hidden_dim,), jnp.float32, -bound, bound)
    return dict(action_embedding=act_emb, target_embedding=tar_emb,
                w_ih=w_ih, w_hh=w_hh, b_ih=b_ih, b_hh=b_hh)


# --------------------------- Pure-JAX reference ------------------------------

def _reference_forward(params, y_act, y_tar, y_lens, h_enc, c_enc):
    """Faithful f32 reference of the PyTorch module (PackedSequence semantics)."""
    act_emb = jnp.take(params["action_embedding"], y_act, axis=0)
    tar_emb = jnp.take(params["target_embedding"], y_tar, axis=0)
    x = jnp.concatenate([act_emb, tar_emb], axis=2)                 # (B,T,2E)
    B, T, _ = x.shape
    H = h_enc.shape[-1]
    h = h_enc.reshape(B, H)
    c = c_enc.reshape(B, H)
    lens = jnp.asarray(y_lens, dtype=jnp.int32)
    outs = []
    for t in range(T):
        gates = x[:, t, :] @ params["w_ih"].T + h @ params["w_hh"].T \
                + params["b_ih"] + params["b_hh"]
        i_g = jax.nn.sigmoid(gates[:, 0 * H:1 * H])
        f_g = jax.nn.sigmoid(gates[:, 1 * H:2 * H])
        g_g = jnp.tanh(gates[:, 2 * H:3 * H])
        o_g = jax.nn.sigmoid(gates[:, 3 * H:4 * H])
        c_new = f_g * c + i_g * g_g
        h_new = o_g * jnp.tanh(c_new)
        valid = (t < lens)[:, None]
        c = jnp.where(valid, c_new, c)
        h = jnp.where(valid, h_new, h)
        outs.append(jnp.where(valid, h_new, 0.0))
    out = jnp.stack(outs, axis=1)
    max_len = int(np.max(np.asarray(y_lens)))
    return out[:, :max_len, :], (h[None], c[None]), lens


# --------------------------------- Main --------------------------------------

if __name__ == "__main__":
    B, T = 2, 8
    EMBEDDING_DIM, HIDDEN_DIM = 32, 32      # 4H = 128 → one full lane span
    N_ACTIONS, N_TARGETS = 10, 12           # len(a2i), len(t2i)

    key = jax.random.PRNGKey(0)
    k_p, k_a, k_t, k_h, k_c = jax.random.split(key, 5)
    params = init_params(k_p, N_ACTIONS, N_TARGETS, EMBEDDING_DIM, HIDDEN_DIM)

    y_act = jax.random.randint(k_a, (B, T), 1, N_ACTIONS, dtype=jnp.int32)
    y_tar = jax.random.randint(k_t, (B, T), 1, N_TARGETS, dtype=jnp.int32)
    y_lens = np.array([8, 5], dtype=np.int32)           # variable lengths
    h_enc = jax.random.normal(k_h, (1, B, HIDDEN_DIM), jnp.float32)
    c_enc = jax.random.normal(k_c, (1, B, HIDDEN_DIM), jnp.float32)

    # t_chunk=4 → grid=(2,): exercises the chunked pipeline + state carry.
    lstm_out, (h_out, c_out), out_lens = decoder_forward(
        params, y_act, y_tar, y_lens, h_enc, c_enc, t_chunk=4)
    jax.block_until_ready((lstm_out, h_out, c_out, out_lens))

    ref_out, (ref_h, ref_c), ref_lens = _reference_forward(
        params, y_act, y_tar, y_lens, h_enc, c_enc)
    # Kernel path uses bf16 matmul inputs (f32 accumulation); reference is
    # pure f32, so tolerances are relaxed accordingly.
    np.testing.assert_allclose(np.asarray(lstm_out), np.asarray(ref_out),
                               rtol=2e-2, atol=2e-2)
    np.testing.assert_allclose(np.asarray(h_out), np.asarray(ref_h),
                               rtol=2e-2, atol=2e-2)
    np.testing.assert_allclose(np.asarray(c_out), np.asarray(ref_c),
                               rtol=2e-2, atol=2e-2)
    np.testing.assert_array_equal(np.asarray(out_lens), np.asarray(ref_lens))

    print("KERNEL_OK")
</pallas_src>

<mosaic_0001>
module attributes {stable_mosaic.version = 11 : i64} {
  func.func @_lstm_decoder_kernel(%arg0: i32, %arg1: memref<2x1xi32, #tpu.memory_space<vmem>>, %arg2: memref<4x2x128xf32, #tpu.memory_space<vmem>>, %arg3: memref<32x128xbf16, #tpu.memory_space<vmem>>, %arg4: memref<2x32xf32, #tpu.memory_space<vmem>>, %arg5: memref<2x32xf32, #tpu.memory_space<vmem>>, %arg6: memref<4x2x32xf32, #tpu.memory_space<vmem>>, %arg7: memref<2x32xf32, #tpu.memory_space<vmem>>, %arg8: memref<2x32xf32, #tpu.memory_space<vmem>>, %arg9: memref<2x32xf32, #tpu.memory_space<vmem>>, %arg10: memref<2x32xf32, #tpu.memory_space<vmem>>) attributes {dimension_semantics = [#tpu.dimension_semantics<arbitrary>], iteration_bounds = array<i64: 2>, scalar_prefetch = 0 : i64, scratch_operands = 2 : i64, tpu.core_type = #tpu.core_type<tc>, window_params = [{pipeline_mode = #tpu.pipeline_mode<synchronous>, transform_indices = @transform_0, window_bounds = array<i64: 2, 1>}, {transform_indices = @transform_1, window_bounds = array<i64: 4, 2, 128>}, {pipeline_mode = #tpu.pipeline_mode<synchronous>, transform_indices = @transform_2, window_bounds = array<i64: 32, 128>}, {pipeline_mode = #tpu.pipeline_mode<synchronous>, transform_indices = @transform_3, window_bounds = array<i64: 2, 32>}, {pipeline_mode = #tpu.pipeline_mode<synchronous>, transform_indices = @transform_4, window_bounds = array<i64: 2, 32>}, {transform_indices = @transform_5, window_bounds = array<i64: 4, 2, 32>}, {pipeline_mode = #tpu.pipeline_mode<synchronous>, transform_indices = @transform_6, window_bounds = array<i64: 2, 32>}, {pipeline_mode = #tpu.pipeline_mode<synchronous>, transform_indices = @transform_7, window_bounds = array<i64: 2, 32>}]} {
    %c0_i32 = arith.constant 0 : i32
    %0 = arith.cmpi eq, %arg0, %c0_i32 : i32
    %1 = arith.extui %0 : i1 to i32
    %c0_i32_0 = arith.constant 0 : i32
    %2 = arith.cmpi ne, %1, %c0_i32_0 : i32
    scf.if %2 {
      %c0_67 = arith.constant 0 : index
      %c0_68 = arith.constant 0 : index
      %155 = vector.load %arg4[%c0_67, %c0_68] : memref<2x32xf32, #tpu.memory_space<vmem>>, vector<2x32xf32>
      %c0_69 = arith.constant 0 : index
      %c0_70 = arith.constant 0 : index
      %156 = vector.load %arg9[%c0_69, %c0_70] : memref<2x32xf32, #tpu.memory_space<vmem>>, vector<2x32xf32>
      tpu.vector_store %arg9[%c0_69, %c0_70], %155 {strides = array<i32>} : memref<2x32xf32, #tpu.memory_space<vmem>>, vector<2x32xf32>,
      %c0_71 = arith.constant 0 : index
      %c0_72 = arith.constant 0 : index
      %157 = vector.load %arg5[%c0_71, %c0_72] : memref<2x32xf32, #tpu.memory_space<vmem>>, vector<2x32xf32>
      %c0_73 = arith.constant 0 : index
      %c0_74 = arith.constant 0 : index
      %158 = vector.load %arg10[%c0_73, %c0_74] : memref<2x32xf32, #tpu.memory_space<vmem>>, vector<2x32xf32>
      tpu.vector_store %arg10[%c0_73, %c0_74], %157 {strides = array<i32>} : memref<2x32xf32, #tpu.memory_space<vmem>>, vector<2x32xf32>,
    } else {
    }
    %c0 = arith.constant 0 : index
    %c0_1 = arith.constant 0 : index
    %3 = vector.load %arg3[%c0, %c0_1] : memref<32x128xbf16, #tpu.memory_space<vmem>>, vector<32x128xbf16>
    %c0_2 = arith.constant 0 : index
    %c0_3 = arith.constant 0 : index
    %4 = vector.load %arg1[%c0_2, %c0_3] : memref<2x1xi32, #tpu.memory_space<vmem>>, vector<2x1xi32>
    %5 = vector.shape_cast %4 : vector<2x1xi32> to vector<2x1xi32>
    %6 = vector.broadcast %5 : vector<2x1xi32> to vector<2x32xi32>
    %c4_i32 = arith.constant 4 : i32
    %7 = arith.muli %arg0, %c4_i32 : i32
    %c0_i32_4 = arith.constant 0 : i32
    %c0_5 = arith.constant 0 : index
    %c0_6 = arith.constant 0 : index
    %8 = vector.load %arg9[%c0_5, %c0_6] : memref<2x32xf32, #tpu.memory_space<vmem>>, vector<2x32xf32>
    %c0_7 = arith.constant 0 : index
    %c0_8 = arith.constant 0 : index
    %9 = vector.load %arg10[%c0_7, %c0_8] : memref<2x32xf32, #tpu.memory_space<vmem>>, vector<2x32xf32>
    %10 = arith.index_cast %c0_i32_4 : i32 to index
    %c0_9 = arith.constant 0 : index
    %c0_10 = arith.constant 0 : index
    %11 = vector.load %arg2[%10, %c0_9, %c0_10] : memref<4x2x128xf32, #tpu.memory_space<vmem>>, vector<1x2x128xf32>
    %12 = vector.shape_cast %11 : vector<1x2x128xf32> to vector<2x128xf32>
    %13 = arith.truncf %8 : vector<2x32xf32> to vector<2x32xbf16>
    %cst = arith.constant dense<0.000000e+00> : vector<2x128xf32>
    %14 = tpu.matmul %13, %3, %cst {dimension_numbers = #tpu.dot_dimension_numbers<[1], [0], [0], [1], [0, 0, 1, 1], [], []>} : vector<2x32xbf16>, vector<32x128xbf16>, vector<2x128xf32> -> vector<2x128xf32>
    %15 = arith.addf %12, %14 : vector<2x128xf32>
    %16 = arith.negf %15 : vector<2x128xf32>
    %17 = math.exp %16 : vector<2x128xf32>
    %cst_11 = arith.constant 1.000000e+00 : f32
    %18 = vector.broadcast %cst_11 : f32 to vector<2x128xf32>
    %19 = arith.addf %18, %17 : vector<2x128xf32>
    %20 = arith.divf %18, %19 : vector<2x128xf32>
    %21 = math.tanh %15 : vector<2x128xf32>
    %22 = vector.extract_strided_slice %20 {offsets = [0, 0], sizes = [2, 32], strides = [1, 1]} : vector<2x128xf32> to vector<2x32xf32>
    %23 = vector.extract_strided_slice %20 {offsets = [0, 32], sizes = [2, 32], strides = [1, 1]} : vector<2x128xf32> to vector<2x32xf32>
    %24 = vector.extract_strided_slice %21 {offsets = [0, 64], sizes = [2, 32], strides = [1, 1]} : vector<2x128xf32> to vector<2x32xf32>
    %25 = vector.extract_strided_slice %20 {offsets = [0, 96], sizes = [2, 32], strides = [1, 1]} : vector<2x128xf32> to vector<2x32xf32>
    %26 = arith.mulf %23, %9 : vector<2x32xf32>
    %27 = arith.mulf %22, %24 : vector<2x32xf32>
    %28 = arith.addf %26, %27 : vector<2x32xf32>
    %29 = math.tanh %28 : vector<2x32xf32>
    %30 = arith.mulf %25, %29 : vector<2x32xf32>
    %31 = arith.addi %7, %c0_i32_4 : i32
    %32 = vector.broadcast %31 : i32 to vector<2x32xi32>
    %33 = arith.cmpi slt, %32, %6 : vector<2x32xi32>
    %34 = arith.select %33, %28, %9 : vector<2x32xi1>, vector<2x32xf32>
    %c0_12 = arith.constant 0 : index
    %c0_13 = arith.constant 0 : index
    %35 = vector.load %arg10[%c0_12, %c0_13] : memref<2x32xf32, #tpu.memory_space<vmem>>, vector<2x32xf32>
    tpu.vector_store %arg10[%c0_12, %c0_13], %34 {strides = array<i32>} : memref<2x32xf32, #tpu.memory_space<vmem>>, vector<2x32xf32>,
    %36 = arith.select %33, %30, %8 : vector<2x32xi1>, vector<2x32xf32>
    %c0_14 = arith.constant 0 : index
    %c0_15 = arith.constant 0 : index
    %37 = vector.load %arg9[%c0_14, %c0_15] : memref<2x32xf32, #tpu.memory_space<vmem>>, vector<2x32xf32>
    tpu.vector_store %arg9[%c0_14, %c0_15], %36 {strides = array<i32>} : memref<2x32xf32, #tpu.memory_space<vmem>>, vector<2x32xf32>,
    %cst_16 = arith.constant 0.000000e+00 : f32
    %38 = vector.broadcast %cst_16 : f32 to vector<2x32xf32>
    %39 = arith.select %33, %30, %38 : vector<2x32xi1>, vector<2x32xf32>
    %40 = arith.index_cast %c0_i32_4 : i32 to index
    %c0_17 = arith.constant 0 : index
    %c0_18 = arith.constant 0 : index
    %41 = vector.load %arg6[%40, %c0_17, %c0_18] : memref<4x2x32xf32, #tpu.memory_space<vmem>>, vector<1x2x32xf32>
    %42 = vector.shape_cast %41 : vector<1x2x32xf32> to vector<2x32xf32>
    %43 = vector.shape_cast %39 : vector<2x32xf32> to vector<1x2x32xf32>
    tpu.vector_store %arg6[%40, %c0_17, %c0_18], %43 {strides = array<i32>} : memref<4x2x32xf32, #tpu.memory_space<vmem>>, vector<1x2x32xf32>,
    %c1_i32 = arith.constant 1 : i32
    %c0_19 = arith.constant 0 : index
    %c0_20 = arith.constant 0 : index
    %44 = vector.load %arg9[%c0_19, %c0_20] : memref<2x32xf32, #tpu.memory_space<vmem>>, vector<2x32xf32>
    %c0_21 = arith.constant 0 : index
    %c0_22 = arith.constant 0 : index
    %45 = vector.load %arg10[%c0_21, %c0_22] : memref<2x32xf32, #tpu.memory_space<vmem>>, vector<2x32xf32>
    %46 = arith.index_cast %c1_i32 : i32 to index
    %c0_23 = arith.constant 0 : index
    %c0_24 = arith.constant 0 : index
    %47 = vector.load %arg2[%46, %c0_23, %c0_24] : memref<4x2x128xf32, #tpu.memory_space<vmem>>, vector<1x2x128xf32>
    %48 = vector.shape_cast %47 : vector<1x2x128xf32> to vector<2x128xf32>
    %49 = arith.truncf %44 : vector<2x32xf32> to vector<2x32xbf16>
    %cst_25 = arith.constant dense<0.000000e+00> : vector<2x128xf32>
    %50 = tpu.matmul %49, %3, %cst_25 {dimension_numbers = #tpu.dot_dimension_numbers<[1], [0], [0], [1], [0, 0, 1, 1], [], []>} : vector<2x32xbf16>, vector<32x128xbf16>, vector<2x128xf32> -> vector<2x128xf32>
    %51 = arith.addf %48, %50 : vector<2x128xf32>
    %52 = arith.negf %51 : vector<2x128xf32>
    %53 = math.exp %52 : vector<2x128xf32>
    %cst_26 = arith.constant 1.000000e+00 : f32
    %54 = vector.broadcast %cst_26 : f32 to vector<2x128xf32>
    %55 = arith.addf %54, %53 : vector<2x128xf32>
    %56 = arith.divf %54, %55 : vector<2x128xf32>
    %57 = math.tanh %51 : vector<2x128xf32>
    %58 = vector.extract_strided_slice %56 {offsets = [0, 0], sizes = [2, 32], strides = [1, 1]} : vector<2x128xf32> to vector<2x32xf32>
    %59 = vector.extract_strided_slice %56 {offsets = [0, 32], sizes = [2, 32], strides = [1, 1]} : vector<2x128xf32> to vector<2x32xf32>
    %60 = vector.extract_strided_slice %57 {offsets = [0, 64], sizes = [2, 32], strides = [1, 1]} : vector<2x128xf32> to vector<2x32xf32>
    %61 = vector.extract_strided_slice %56 {offsets = [0, 96], sizes = [2, 32], strides = [1, 1]} : vector<2x128xf32> to vector<2x32xf32>
    %62 = arith.mulf %59, %45 : vector<2x32xf32>
    %63 = arith.mulf %58, %60 : vector<2x32xf32>
    %64 = arith.addf %62, %63 : vector<2x32xf32>
    %65 = math.tanh %64 : vector<2x32xf32>
    %66 = arith.mulf %61, %65 : vector<2x32xf32>
    %67 = arith.addi %7, %c1_i32 : i32
    %68 = vector.broadcast %67 : i32 to vector<2x32xi32>
    %69 = arith.cmpi slt, %68, %6 : vector<2x32xi32>
    %70 = arith.select %69, %64, %45 : vector<2x32xi1>, vector<2x32xf32>
    %c0_27 = arith.constant 0 : index
    %c0_28 = arith.constant 0 : index
    %71 = vector.load %arg10[%c0_27, %c0_28] : memref<2x32xf32, #tpu.memory_space<vmem>>, vector<2x32xf32>
    tpu.vector_store %arg10[%c0_27, %c0_28], %70 {strides = array<i32>} : memref<2x32xf32, #tpu.memory_space<vmem>>, vector<2x32xf32>,
    %72 = arith.select %69, %66, %44 : vector<2x32xi1>, vector<2x32xf32>
    %c0_29 = arith.constant 0 : index
    %c0_30 = arith.constant 0 : index
    %73 = vector.load %arg9[%c0_29, %c0_30] : memref<2x32xf32, #tpu.memory_space<vmem>>, vector<2x32xf32>
    tpu.vector_store %arg9[%c0_29, %c0_30], %72 {strides = array<i32>} : memref<2x32xf32, #tpu.memory_space<vmem>>, vector<2x32xf32>,
    %cst_31 = arith.constant 0.000000e+00 : f32
    %74 = vector.broadcast %cst_31 : f32 to vector<2x32xf32>
    %75 = arith.select %69, %66, %74 : vector<2x32xi1>, vector<2x32xf32>
    %76 = arith.index_cast %c1_i32 : i32 to index
    %c0_32 = arith.constant 0 : index
    %c0_33 = arith.constant 0 : index
    %77 = vector.load %arg6[%76, %c0_32, %c0_33] : memref<4x2x32xf32, #tpu.memory_space<vmem>>, vector<1x2x32xf32>
    %78 = vector.shape_cast %77 : vector<1x2x32xf32> to vector<2x32xf32>
    %79 = vector.shape_cast %75 : vector<2x32xf32> to vector<1x2x32xf32>
    tpu.vector_store %arg6[%76, %c0_32, %c0_33], %79 {strides = array<i32>} : memref<4x2x32xf32, #tpu.memory_space<vmem>>, vector<1x2x32xf32>,
    %c2_i32 = arith.constant 2 : i32
    %c0_34 = arith.constant 0 : index
    %c0_35 = arith.constant 0 : index
    %80 = vector.load %arg9[%c0_34, %c0_35] : memref<2x32xf32, #tpu.memory_space<vmem>>, vector<2x32xf32>
    %c0_36 = arith.constant 0 : index
    %c0_37 = arith.constant 0 : index
    %81 = vector.load %arg10[%c0_36, %c0_37] : memref<2x32xf32, #tpu.memory_space<vmem>>, vector<2x32xf32>
    %82 = arith.index_cast %c2_i32 : i32 to index
    %c0_38 = arith.constant 0 : index
    %c0_39 = arith.constant 0 : index
    %83 = vector.load %arg2[%82, %c0_38, %c0_39] : memref<4x2x128xf32, #tpu.memory_space<vmem>>, vector<1x2x128xf32>
    %84 = vector.shape_cast %83 : vector<1x2x128xf32> to vector<2x128xf32>
    %85 = arith.truncf %80 : vector<2x32xf32> to vector<2x32xbf16>
    %cst_40 = arith.constant dense<0.000000e+00> : vector<2x128xf32>
    %86 = tpu.matmul %85, %3, %cst_40 {dimension_numbers = #tpu.dot_dimension_numbers<[1], [0], [0], [1], [0, 0, 1, 1], [], []>} : vector<2x32xbf16>, vector<32x128xbf16>, vector<2x128xf32> -> vector<2x128xf32>
    %87 = arith.addf %84, %86 : vector<2x128xf32>
    %88 = arith.negf %87 : vector<2x128xf32>
    %89 = math.exp %88 : vector<2x128xf32>
    %cst_41 = arith.constant 1.000000e+00 : f32
    %90 = vector.broadcast %cst_41 : f32 to vector<2x128xf32>
    %91 = arith.addf %90, %89 : vector<2x128xf32>
    %92 = arith.divf %90, %91 : vector<2x128xf32>
    %93 = math.tanh %87 : vector<2x128xf32>
    %94 = vector.extract_strided_slice %92 {offsets = [0, 0], sizes = [2, 32], strides = [1, 1]} : vector<2x128xf32> to vector<2x32xf32>
    %95 = vector.extract_strided_slice %92 {offsets = [0, 32], sizes = [2, 32], strides = [1, 1]} : vector<2x128xf32> to vector<2x32xf32>
    %96 = vector.extract_strided_slice %93 {offsets = [0, 64], sizes = [2, 32], strides = [1, 1]} : vector<2x128xf32> to vector<2x32xf32>
    %97 = vector.extract_strided_slice %92 {offsets = [0, 96], sizes = [2, 32], strides = [1, 1]} : vector<2x128xf32> to vector<2x32xf32>
    %98 = arith.mulf %95, %81 : vector<2x32xf32>
    %99 = arith.mulf %94, %96 : vector<2x32xf32>
    %100 = arith.addf %98, %99 : vector<2x32xf32>
    %101 = math.tanh %100 : vector<2x32xf32>
    %102 = arith.mulf %97, %101 : vector<2x32xf32>
    %103 = arith.addi %7, %c2_i32 : i32
    %104 = vector.broadcast %103 : i32 to vector<2x32xi32>
    %105 = arith.cmpi slt, %104, %6 : vector<2x32xi32>
    %106 = arith.select %105, %100, %81 : vector<2x32xi1>, vector<2x32xf32>
    %c0_42 = arith.constant 0 : index
    %c0_43 = arith.constant 0 : index
    %107 = vector.load %arg10[%c0_42, %c0_43] : memref<2x32xf32, #tpu.memory_space<vmem>>, vector<2x32xf32>
    tpu.vector_store %arg10[%c0_42, %c0_43], %106 {strides = array<i32>} : memref<2x32xf32, #tpu.memory_space<vmem>>, vector<2x32xf32>,
    %108 = arith.select %105, %102, %80 : vector<2x32xi1>, vector<2x32xf32>
    %c0_44 = arith.constant 0 : index
    %c0_45 = arith.constant 0 : index
    %109 = vector.load %arg9[%c0_44, %c0_45] : memref<2x32xf32, #tpu.memory_space<vmem>>, vector<2x32xf32>
    tpu.vector_store %arg9[%c0_44, %c0_45], %108 {strides = array<i32>} : memref<2x32xf32, #tpu.memory_space<vmem>>, vector<2x32xf32>,
    %cst_46 = arith.constant 0.000000e+00 : f32
    %110 = vector.broadcast %cst_46 : f32 to vector<2x32xf32>
    %111 = arith.select %105, %102, %110 : vector<2x32xi1>, vector<2x32xf32>
    %112 = arith.index_cast %c2_i32 : i32 to index
    %c0_47 = arith.constant 0 : index
    %c0_48 = arith.constant 0 : index
    %113 = vector.load %arg6[%112, %c0_47, %c0_48] : memref<4x2x32xf32, #tpu.memory_space<vmem>>, vector<1x2x32xf32>
    %114 = vector.shape_cast %113 : vector<1x2x32xf32> to vector<2x32xf32>
    %115 = vector.shape_cast %111 : vector<2x32xf32> to vector<1x2x32xf32>
    tpu.vector_store %arg6[%112, %c0_47, %c0_48], %115 {strides = array<i32>} : memref<4x2x32xf32, #tpu.memory_space<vmem>>, vector<1x2x32xf32>,
    %c3_i32 = arith.constant 3 : i32
    %c0_49 = arith.constant 0 : index
    %c0_50 = arith.constant 0 : index
    %116 = vector.load %arg9[%c0_49, %c0_50] : memref<2x32xf32, #tpu.memory_space<vmem>>, vector<2x32xf32>
    %c0_51 = arith.constant 0 : index
    %c0_52 = arith.constant 0 : index
    %117 = vector.load %arg10[%c0_51, %c0_52] : memref<2x32xf32, #tpu.memory_space<vmem>>, vector<2x32xf32>
    %118 = arith.index_cast %c3_i32 : i32 to index
    %c0_53 = arith.constant 0 : index
    %c0_54 = arith.constant 0 : index
    %119 = vector.load %arg2[%118, %c0_53, %c0_54] : memref<4x2x128xf32, #tpu.memory_space<vmem>>, vector<1x2x128xf32>
    %120 = vector.shape_cast %119 : vector<1x2x128xf32> to vector<2x128xf32>
    %121 = arith.truncf %116 : vector<2x32xf32> to vector<2x32xbf16>
    %cst_55 = arith.constant dense<0.000000e+00> : vector<2x128xf32>
    %122 = tpu.matmul %121, %3, %cst_55 {dimension_numbers = #tpu.dot_dimension_numbers<[1], [0], [0], [1], [0, 0, 1, 1], [], []>} : vector<2x32xbf16>, vector<32x128xbf16>, vector<2x128xf32> -> vector<2x128xf32>
    %123 = arith.addf %120, %122 : vector<2x128xf32>
    %124 = arith.negf %123 : vector<2x128xf32>
    %125 = math.exp %124 : vector<2x128xf32>
    %cst_56 = arith.constant 1.000000e+00 : f32
    %126 = vector.broadcast %cst_56 : f32 to vector<2x128xf32>
    %127 = arith.addf %126, %125 : vector<2x128xf32>
    %128 = arith.divf %126, %127 : vector<2x128xf32>
    %129 = math.tanh %123 : vector<2x128xf32>
    %130 = vector.extract_strided_slice %128 {offsets = [0, 0], sizes = [2, 32], strides = [1, 1]} : vector<2x128xf32> to vector<2x32xf32>
    %131 = vector.extract_strided_slice %128 {offsets = [0, 32], sizes = [2, 32], strides = [1, 1]} : vector<2x128xf32> to vector<2x32xf32>
    %132 = vector.extract_strided_slice %129 {offsets = [0, 64], sizes = [2, 32], strides = [1, 1]} : vector<2x128xf32> to vector<2x32xf32>
    %133 = vector.extract_strided_slice %128 {offsets = [0, 96], sizes = [2, 32], strides = [1, 1]} : vector<2x128xf32> to vector<2x32xf32>
    %134 = arith.mulf %131, %117 : vector<2x32xf32>
    %135 = arith.mulf %130, %132 : vector<2x32xf32>
    %136 = arith.addf %134, %135 : vector<2x32xf32>
    %137 = math.tanh %136 : vector<2x32xf32>
    %138 = arith.mulf %133, %137 : vector<2x32xf32>
    %139 = arith.addi %7, %c3_i32 : i32
    %140 = vector.broadcast %139 : i32 to vector<2x32xi32>
    %141 = arith.cmpi slt, %140, %6 : vector<2x32xi32>
    %142 = arith.select %141, %136, %117 : vector<2x32xi1>, vector<2x32xf32>
    %c0_57 = arith.constant 0 : index
    %c0_58 = arith.constant 0 : index
    %143 = vector.load %arg10[%c0_57, %c0_58] : memref<2x32xf32, #tpu.memory_space<vmem>>, vector<2x32xf32>
    tpu.vector_store %arg10[%c0_57, %c0_58], %142 {strides = array<i32>} : memref<2x32xf32, #tpu.memory_space<vmem>>, vector<2x32xf32>,
    %144 = arith.select %141, %138, %116 : vector<2x32xi1>, vector<2x32xf32>
    %c0_59 = arith.constant 0 : index
    %c0_60 = arith.constant 0 : index
    %145 = vector.load %arg9[%c0_59, %c0_60] : memref<2x32xf32, #tpu.memory_space<vmem>>, vector<2x32xf32>
    tpu.vector_store %arg9[%c0_59, %c0_60], %144 {strides = array<i32>} : memref<2x32xf32, #tpu.memory_space<vmem>>, vector<2x32xf32>,
    %cst_61 = arith.constant 0.000000e+00 : f32
    %146 = vector.broadcast %cst_61 : f32 to vector<2x32xf32>
    %147 = arith.select %141, %138, %146 : vector<2x32xi1>, vector<2x32xf32>
    %148 = arith.index_cast %c3_i32 : i32 to index
    %c0_62 = arith.constant 0 : index
    %c0_63 = arith.constant 0 : index
    %149 = vector.load %arg6[%148, %c0_62, %c0_63] : memref<4x2x32xf32, #tpu.memory_space<vmem>>, vector<1x2x32xf32>
    %150 = vector.shape_cast %149 : vector<1x2x32xf32> to vector<2x32xf32>
    %151 = vector.shape_cast %147 : vector<2x32xf32> to vector<1x2x32xf32>
    tpu.vector_store %arg6[%148, %c0_62, %c0_63], %151 {strides = array<i32>} : memref<4x2x32xf32, #tpu.memory_space<vmem>>, vector<1x2x32xf32>,
    %c4_i32_64 = arith.constant 4 : i32
    %c1_i32_65 = arith.constant 1 : i32
    %152 = arith.cmpi eq, %arg0, %c1_i32_65 : i32
    %153 = arith.extui %152 : i1 to i32
    %c0_i32_66 = arith.constant 0 : i32
    %154 = arith.cmpi ne, %153, %c0_i32_66 : i32
    scf.if %154 {
      %c0_67 = arith.constant 0 : index
      %c0_68 = arith.constant 0 : index
      %155 = vector.load %arg9[%c0_67, %c0_68] : memref<2x32xf32, #tpu.memory_space<vmem>>, vector<2x32xf32>
      %c0_69 = arith.constant 0 : index
      %c0_70 = arith.constant 0 : index
      %156 = vector.load %arg7[%c0_69, %c0_70] : memref<2x32xf32, #tpu.memory_space<vmem>>, vector<2x32xf32>
      tpu.vector_store %arg7[%c0_69, %c0_70], %155 {strides = array<i32>} : memref<2x32xf32, #tpu.memory_space<vmem>>, vector<2x32xf32>,
      %c0_71 = arith.constant 0 : index
      %c0_72 = arith.constant 0 : index
      %157 = vector.load %arg10[%c0_71, %c0_72] : memref<2x32xf32, #tpu.memory_space<vmem>>, vector<2x32xf32>
      %c0_73 = arith.constant 0 : index
      %c0_74 = arith.constant 0 : index
      %158 = vector.load %arg8[%c0_73, %c0_74] : memref<2x32xf32, #tpu.memory_space<vmem>>, vector<2x32xf32>
      tpu.vector_store %arg8[%c0_73, %c0_74], %157 {strides = array<i32>} : memref<2x32xf32, #tpu.memory_space<vmem>>, vector<2x32xf32>,
    } else {
    }
    return
  }
  func.func @transform_0(%arg0: i32) -> (i32, i32) {
    %c0_i32 = arith.constant 0 : i32
    %c0_i32_0 = arith.constant 0 : i32
    %c0_i32_1 = arith.constant 0 : i32
    return %c0_i32, %c0_i32_0 : i32, i32
  }
  func.func @transform_1(%arg0: i32) -> (i32, i32, i32) {
    %c0_i32 = arith.constant 0 : i32
    %c0_i32_0 = arith.constant 0 : i32
    %c0_i32_1 = arith.constant 0 : i32
    return %arg0, %c0_i32, %c0_i32_0 : i32, i32, i32
  }
  func.func @transform_2(%arg0: i32) -> (i32, i32) {
    %c0_i32 = arith.constant 0 : i32
    %c0_i32_0 = arith.constant 0 : i32
    %c0_i32_1 = arith.constant 0 : i32
    return %c0_i32, %c0_i32_0 : i32, i32
  }
  func.func @transform_3(%arg0: i32) -> (i32, i32) {
    %c0_i32 = arith.constant 0 : i32
    %c0_i32_0 = arith.constant 0 : i32
    %c0_i32_1 = arith.constant 0 : i32
    return %c0_i32, %c0_i32_0 : i32, i32
  }
  func.func @transform_4(%arg0: i32) -> (i32, i32) {
    %c0_i32 = arith.constant 0 : i32
    %c0_i32_0 = arith.constant 0 : i32
    %c0_i32_1 = arith.constant 0 : i32
    return %c0_i32, %c0_i32_0 : i32, i32
  }
  func.func @transform_5(%arg0: i32) -> (i32, i32, i32) {
    %c0_i32 = arith.constant 0 : i32
    %c0_i32_0 = arith.constant 0 : i32
    %c0_i32_1 = arith.constant 0 : i32
    return %arg0, %c0_i32, %c0_i32_0 : i32, i32, i32
  }
  func.func @transform_6(%arg0: i32) -> (i32, i32) {
    %c0_i32 = arith.constant 0 : i32
    %c0_i32_0 = arith.constant 0 : i32
    %c0_i32_1 = arith.constant 0 : i32
    return %c0_i32, %c0_i32_0 : i32, i32
  }
  func.func @transform_7(%arg0: i32) -> (i32, i32) {
    %c0_i32 = arith.constant 0 : i32
    %c0_i32_0 = arith.constant 0 : i32
    %c0_i32_1 = arith.constant 0 : i32
    return %c0_i32, %c0_i32_0 : i32, i32
  }
}

</mosaic_0001>

<bundles_post_ra>
// kernel: tpu_custom_call.1
= control target key start
LH: loop header
LB: loop body
LE: loop exit
PB: predicated region body
PF: predicated region fallthrough
CT: control target
= control target key end

     0   :  { %s1691_s0 = inlined_call_operand.vmem [shape: s32[2,1], index: 0, kind: input, shape index: {}]   ;;  %s1692_s1 = inlined_call_operand.hbm [shape: f32[8,2,128], index: 1, kind: input, shape index: {}]   ;;  %s1693_s2 = inlined_call_operand.hbm [shape: bf16[32,128], index: 2, kind: input, shape index: {}]   ;;  %s1694_s3 = inlined_call_operand.vmem [shape: f32[2,32], index: 3, kind: input, shape index: {}]   ;;  %s1695_s4 = inlined_call_operand.vmem [shape: f32[2,32], index: 4, kind: input, shape index: {}]   ;;  %s1696_s5 = inlined_call_operand.hbm [shape: f32[8,2,32], index: 5, kind: output, shape index: {0}]   ;;  %s1697_s6 = inlined_call_operand.hbm [shape: f32[2,32], index: 6, kind: output, shape index: {1}]   ;;  %s1698_s7 = inlined_call_operand.hbm [shape: f32[2,32], index: 7, kind: output, shape index: {2}]  }
   0x1   :  { %1703 = sst [smem:[#allocation17_spill]] %s1693_s2 }
   0x2   :  { %13 = vsyncpa [#allocation5], 0 }
   0x3   :  { %15 = vsyncpa [#allocation5 + $0x1], 0 }
   0x4   :  { %16 = vsyncpa [#allocation8], 0 }
   0x5   :  { %17 = vsyncpa [#allocation6], 0 }
   0x6   :  { %19 = vsyncpa [#allocation6 + $0x1], 0 }
   0x7   :  { %20 = vsyncpa [#allocation11], 0  ;;  %s1335_s24 = smov 0   ;;  %s1337_s25 = smov 0  }
   0x8   :  { %s1339_s26 = smov 0   ;;  %s1341_s27 = smov 0  }
   0x9 LB: > { %s1356_s28 = sadd.s32 4294967295, %s1277_s27   ;;  %s900_s29 = sadd.s32 4294967294, %s1277_s27   ;;  %s1277_s27 = sphi %s1341_s27, %s1731_s27   ;;  %s1273_s26 = sphi %s1339_s26, %s1730_s26   ;;  %s1269_s25 = sphi %s1337_s25, %s1729_s25   ;;  %s1265_s24 = sphi %s1335_s24, %s1728_s24  }
   0xa   : > { %p67_p0 = scmp.ne.s32.totalorder %s1269_s25, %s1265_s24  ;;  %p1699_p1 = scmp.eq.s32.totalorder %s1356_s28, 0 }
   0xb   : > { %p160_p3 = scmp.eq.s32.totalorder %s900_s29, 1  ;;  %p901_p5 = scmp.ge.s32.totalorder %s1277_s27, 1 }
   0xc   : > { %p1365_p4 = por %p1699_p1, %p67_p0  ;;  %p209_p7 = scmp.lt.s32.totalorder %s1277_s27, 3 }
   0xd   : > { %p1370_p6 = por %p160_p3, %p67_p0  ;;  %s1279_s10 = smov [#allocation7]  }
   0xe   : > { %s1704_s30 = scalar_select %p1365_p4, 1, 0 }
   0xf   : > { %s1705_s8 = scalar_select %p1370_p6, 1, 0 }
  0x10   : > { %p1376_p9 = pnand %p901_p5, %p209_p7  ;;  %s224_s11 = sshll.u32 %s1279_s10, 4  ;;  %s225_s11 = int_to_ptr.vmem [resolvable:$true] %s224_s11 }
  0x11   : > { %s1390_s13 = sadd.s32 1, %s1277_s27   ;;  %s54_s14 = sadd.s32 1, %s1273_s26 }
  0x12   : > { %s1706_s9 = scalar_select %p1376_p9, 1, 0 }
  0x13   : > { %p1001_p10 = pneg %p1376_p9  ;;  %s51_s15 = ssub.s32 %s1277_s27, %s1390_s13 }
  0x14   : > { %s1114_s16 = scalar_lea.vmem %s225_s11, 256  ;;  %p1122_p7 = scmp.lt.s32.totalorder %s225_s11, %s225_s11 }
  0x15   : > { %p1385_p12 = pnand %p1001_p10, %p1699_p1  ;;  %p1115_p0 = scmp.ne.s32.totalorder %s225_s11, %s1114_s16 }
  0x16   : > { %p1123_p8 = scmp.lt.s32.totalorder %s1114_s16, %s1114_s16 }
  0x17   : > { %p1105_p13 = pneg %p1385_p12 }
  0x18   : > { %p1124_p11 = por %p1123_p8, %p1122_p7 }
  0x19   : > { %p1117_p3 = pnand %p1115_p0, %p1105_p13 }
  0x1b   : > { %p1118_p5 = pneg %p1117_p3 }
  0x1d   : > { %p1125_p2 = pnand %p1124_p11, %p1118_p5 }
  0x1f   : > { %1128 = shalt.err (!%p1125_p2)
}
  0x20   : > { %s1280_s17 = smov 64   ;;  %s1281_s18 = smov 4  }
  0x21   : > { %s1708_s2 = sld [smem:[#allocation17_spill]]  ;;  %p52_p10 = scmp.eq.s32.totalorder %s51_s15, 0 }
  0x22   : > { %p61_p8 = scmp.ne.s32.totalorder %s1273_s26, %s1269_s25  ;;  %p62_p11 = scmp.eq.s32.totalorder %s1277_s27, 0 }
  0x23   : > { %p1014_p2 = scmp.lt.s32.totalorder %s1277_s27, 2  ;;  %p1709_p0 = scmp.eq.s32.totalorder %s1356_s28, 1 }
  0x24   : > { %s1407_s21 = scalar_select %p52_p10, %s1273_s26, %s54_s14  }
  0x25   : > { %p63_p13 = por %p62_p11, %p61_p8  ;;  %p1411_p3 = por %p1709_p0, %p61_p8 }
  0x26   : > { %s244_s23 = sand.u32 1, %s1273_s26   ;;  %s939_s29 = sshll.u32 %s1277_s27, 7 }
  0x27   : > { %1004 = dma.hbm_to_vmem [thread:$0]  (!%p1385_p12), %s1708_s2, 256, %s225_s11, [#allocation8], %s1280_s17, %s1280_s17, %s1281_s18  }
  0x28   : > { %s1710_s22 = scalar_select %p1411_p3, 1, 0 }
  0x29   : > { %s904_s10 = sshll.u32 %s244_s23, 3  ;;  %s1420_s19 = scalar_lea.hbm %s1692_s1, %s939_s29 }
  0x2a   : > { %s248_s11 = scalar_lea.vmem [#allocation4], %s904_s10  ;;  %p1422_p12 = pnand %p1014_p2, %p63_p13 }
  0x2b   : > { %s255_s14 = sshll.u32 %s248_s11, 4  ;;  %s1428_s17 = scalar_lea.sflag [#allocation5], %s244_s23  ;;  %s1426_s14 = int_to_ptr.vmem [resolvable:$true] %s255_s14 }
  0x2c   : > { %s1129_s18 = scalar_lea.hbm %s1420_s19, 128  ;;  %p1131_p7 = pneg %p1422_p12 }
  0x2d   : > { %p1130_p5 = scmp.ne.s32.totalorder %s1420_s19, %s1129_s18  ;;  %s1134_s10 = scalar_lea.hbm %s1692_s1, 256 }
  0x2e   : > { %p1135_p11 = scmp.lt.s32.totalorder %s1420_s19, %s1692_s1  ;;  %p1136_p2 = scmp.lt.s32.totalorder %s1134_s10, %s1129_s18 }
  0x2f   : > { %p1132_p10 = pnand %p1131_p7, %p1130_p5 }
  0x30   : > { %p1137_p13 = por %p1136_p2, %p1135_p11 }
  0x31   : > { %p1133_p8 = pneg %p1132_p10 }
  0x33   : > { %p1138_p0 = pnand %p1137_p13, %p1133_p8 }
  0x35   : > { %1141 = shalt.err (!%p1138_p0)
}
  0x36   : > { %s1142_s23 = scalar_lea.vmem %s1426_s14, 128  ;;  %s1282_s11 = smov [#allocation4]  }
  0x37   : > { %p1143_p1 = scmp.ne.s32.totalorder %s1426_s14, %s1142_s23  ;;  %s1147_s2 = sshll.u32 %s1282_s11, 4  ;;  %s1148_s2 = int_to_ptr.vmem [resolvable:$false] %s1147_s2 }
  0x38   : > { %s1149_s20 = scalar_lea.vmem %s1148_s2, 256  ;;  %p1150_p10 = scmp.lt.s32.totalorder %s1426_s14, %s1148_s2 }
  0x39   : > { %p1145_p6 = pnand %p1143_p1, %p1131_p7  ;;  %p1151_p3 = scmp.lt.s32.totalorder %s1149_s20, %s1142_s23 }
  0x3b   : > { %p1146_p5 = pneg %p1145_p6  ;;  %p1152_p4 = por %p1151_p3, %p1150_p10 }
  0x3d   : > { %p1153_p9 = pnand %p1152_p4, %p1146_p5 }
  0x3f   : > { %1156 = shalt.err (!%p1153_p9)
}
  0x40   : > { %s1283_s18 = smov 32   ;;  %s1284_s29 = smov 2  }
  0x41   : > { %1008 = dma.hbm_to_vmem [thread:$0]  (!%p1422_p12), %s1420_s19, 128, %s1426_s14, %s1428_s17, %s1283_s18, %s1283_s18, %s1284_s29  }
  0x42   : > { %p1712_p1 = scmp.ne.s32.totalorder %s1706_s9, 0 }
  0x43   : > { %s1452_s10 = sand.u32 (!%p1712_p1), 1, %s1269_s25   ;;  %p1713_p4 = scmp.ne.s32.totalorder (!%p1712_p1), %s1704_s30, 0 }
  0x44   : > { %267 = sbr.rel (%p1712_p1) target bundleno = 2951 (0xb87), region = 40  ;;  %s908_s2 = sshll.u32 (!%p1712_p1), %s1452_s10, 3 }
  0x45   : > { %s270_s12 = scalar_lea.sflag (!%p1712_p1), [#allocation5], %s1452_s10  ;;  %s1456_s16 = scalar_lea.vmem (!%p1712_p1), [#allocation4], %s908_s2 }
  0x49   : > { %1248 = dma.done.wait (%p1713_p4), %s270_s12, 128  }
  0x4a   : > { %1250 = vsyncadd (%p1713_p4), %s270_s12, 4294967168  ;;  %p1714_p6 = scmp.eq.s32.totalorder %s1356_s28, 0 }
  0x4c   : > { %1252 = dma.done.wait (%p1714_p6), [#allocation8], 256   ;;  %p1715_p9 = pmov %p1714_p6 }
  0x4d   : > { %s1466_s9 = scalar_lea.vmem [#allocation9], %s908_s2  ;;  %p1716_p3 = scmp.ne.s32.totalorder %s1356_s28, 0 }
  0x4e   : > { %1254 = vsyncadd (%p1715_p9), [#allocation8], 4294967040 }
  0x4f   : > { %314 = sbr.rel (%p1716_p3) target bundleno = 87 (0x57), region = 52 }
  0x54   : > { %v315_v0 = vld [vmem:[%s1694_s3] sm:$0x3]  ;;  %vm316_vm0 = vcmask 254976  }
  0x55   : > { %v318_v1 = vld [vmem:[%s1695_s4] sm:$0x3]  ;;  %317 = vst.msk [vmem:[#allocation2] sm:$0x3] %vm316_vm0, %v315_v0 }
  0x56   : > { %319 = vst.msk [vmem:[#allocation3] sm:$0x3] %vm316_vm0, %v318_v1 }
  0x57 PF: > { %v1476_v2 = vld [vmem:[#allocation7 + $0x8] sm:$0xff]   ;;  %v1285_v3 = vmov 0.0   ;;  %v1481_v4 = vld [vmem:[#allocation7] sm:$0xff]   ;;  %vm1286_vm1 = vmmov 0   ;;  %vm345_vm2 = vcmask 261120   ;;  %v1287_v13 = vmov 0  }
  0x58   : > { %953 = vmatprep.subr.bf16.mxu0 %v1285_v3  ;;  %961 = vmatprep.subr.bf16.mxu1 %v1285_v3  ;;  %v331_v7 = vld [vmem:[%s1456_s16] sm:$0x3]  ;;  %s1288_s30 = smov 64   ;;  %s1289_s23 = smov 32   ;;  %v324_v22 = vld [vmem:[%s1691_s0] sm:$0x3] }
  0x59   : > { %954 = vmatpush3.bf16.msra.mxu0 %v1476_v2  ;;  %957 = vmatprep.mubr.msk.bf16.mxu0 %vm1286_vm1, %v1285_v3  ;;  %s1290_s18 = smov 96   ;;  %s1509_s29 = sshll.u32 %s1356_s28, 2  ;;  %vm425_vm4 = vcmask 254976   ;;  %v917_v41 = vld [vmem:[%s1456_s16 + $0x2] sm:$0x3] }
  0x5a   : > { %955 = vmatprep.subr.bf16.mxu0 %v1285_v3  ;;  %962 = vmatpush3.bf16.msra.mxu1 %v1476_v2  ;;  %v418_v27 = vstv %s1509_s29  ;;  %s520_s2 = sadd.s32 1, %s1509_s29  ;;  %s623_s12 = sadd.s32 2, %s1509_s29 }
  0x5b   : > { %963 = vmatprep.subr.bf16.mxu1 %v1285_v3  ;;  %965 = vmatprep.mubr.msk.bf16.mxu1 %vm1286_vm1, %v1285_v3  ;;  %v1543_v56 = vstv %s520_s2  ;;  %p929_p12 = scmp.ne.s32.totalorder %s1356_s28, 1 }
  0x5c   : > { %v329_v5 = vld [vmem:[#allocation2] sm:$0x3]  ;;  %1067 = vset.pattern.permute.xlu1 %v1287_v13  ;;  %1068 = vset.pattern.permute.xlu0 %v1287_v13 }
  0x5d   : > { %v332_v6 = vpack.c.bf16 %v329_v5, %v329_v5  ;;  %956 = vmatpush3.bf16.msra.mxu0 %v1481_v4  ;;  %v330_v15 = vld [vmem:[#allocation3] sm:$0x3] }
  0x5e   : > { %964 = vmatpush3.bf16.msra.mxu1 %v1481_v4  ;;  %969 = vmatprep.subr.bf16.mxu0 %v1285_v3 }
  0x5f   : > { %977 = vmatprep.subr.bf16.mxu1 %v1285_v3 }
  0x60   : > { %958 = vmatmul.mubr.msk.bf16.vlgmr.msra.gmra.mxu0 %vm345_vm2, %v332_v6  ;;  %v921_v6 = vld [vmem:[%s1456_s16 + $0x4] sm:$0x3] }
  0x61   : > { %970 = vmatpush3.bf16.msra.mxu0 %v1476_v2  ;;  %973 = vmatprep.mubr.msk.bf16.mxu0 %vm1286_vm1, %v1285_v3 }
  0x62   : > { %971 = vmatprep.subr.bf16.mxu0 %v1285_v3 }
  0x65   : > { %972 = vmatpush3.bf16.msra.mxu0 %v1481_v4 }
 0x120   : > { %v383_v8 = vpop.f32.mrf.mxu0 }
 0x121   : > { %v389_v9 = vadd.f32 %v383_v8, %v331_v7 }
 0x122   : > { %v959_v10 = vpop.f32.mrf.mxu0 }
 0x123   : > { %1071 = vtanh.f32 %v389_v9  ;;  %v916_v16 = vmul.f32 -1.442695, %v389_v9 }
 0x124   : > { %v386_v11 = vpop.f32.mrf.mxu0 }
 0x125   : > { %1073 = vpow2.f32 %v916_v16 }
 0x126   : > { %v960_v12 = vpop.f32.mrf.mxu0 }
 0x130   : > { %v1072_v14 = vpop.eup %1071 }
 0x131   : > { %403 = vrot.lane.b32.xlu0 %v1072_v14, %s1288_s30 }
 0x132   : > { %v1074_v17 = vpop.eup %1073 }
 0x133   : > { %v393_v18 = vadd.f32 1.0, %v1074_v17 }
 0x135   : > { %398 = vrot.lane.b32.xlu0 %v330_v15, %s1289_s23  ;;  %1075 = vrcp.f32 %v393_v18 }
 0x142   : > { %v1076_v19 = vpop.eup %1075 }
 0x1a3   : > { %v404_v20 = vpop.permute.xlu0 %403 }
 0x1a4   : > { %v406_v21 = vmul.f32 %v1076_v19, %v404_v20 }
 0x1a6   : > { %408 = vrot.lane.b32.xlu1 %v406_v21, %s1289_s23  ;;  %v624_v21 = vstv %s623_s12 }
 0x1a7   : > { %v399_v23 = vpop.permute.xlu0 %398 }
 0x1a8   : > { %v401_v24 = vmul.f32 %v1076_v19, %v399_v23 }
 0x1aa   : > { %326 = vperm.xlu1 %1067, %v324_v22  }
 0x1ae   : > { %428 = vrot.lane.b32.xlu1 %v329_v5, %s1290_s18 }
 0x218   : > { %v409_v25 = vpop.permute.xlu1 %408 }
 0x219   : > { %v411_v26 = vadd.f32 %v409_v25, %v401_v24 }
 0x21b   : > { %1077 = vtanh.f32 %v411_v26 }
 0x225   : > { %v1512_v28 = vpop.permute.xlu1 %326 }
 0x226   : > { %vm1515_vm3 = vcmp.lt.s32.totalorder %v418_v27, %v1512_v28  ;;  %vm522_vm5 = vcmp.lt.s32.totalorder %v1543_v56, %v1512_v28  ;;  %vm625_vm6 = vcmp.lt.s32.totalorder %v624_v21, %v1512_v28 }
 0x227   : > { %v420_v30 = vsel %vm1515_vm3, %v411_v26, %v399_v23 }
 0x228   : > { %v1078_v31 = vpop.eup %1077  ;;  %422 = vrot.lane.b32.xlu1 %v420_v30, %s1290_s18 }
 0x229   : > { %414 = vrot.lane.b32.xlu0 %v1078_v31, %s1288_s30  ;;  %v429_v32 = vpop.permute.xlu1 %428 }
 0x29a   : > { %v423_v33 = vpop.permute.xlu1 %422 }
 0x29b   : > { %426 = vst.msk [vmem:[#allocation3] sm:$0x3] %vm425_vm4, %v423_v33  ;;  %v415_v34 = vpop.permute.xlu0 %414 }
 0x29c   : > { %v1524_v35 = vmul.f32 %v1076_v19, %v415_v34 }
 0x29e   : > { %v431_v36 = vsel %vm1515_vm3, %v1524_v35, %v429_v32 }
 0x29f   : > { %433 = vrot.lane.b32.xlu0 %v431_v36, %s1289_s23 }
 0x2a2   : > { %v444_v37 = vld [vmem:[#allocation3] sm:$0x3] }
 0x2a3   : > { %500 = vrot.lane.b32.xlu1 %v444_v37, %s1289_s23 }
 0x311   : > { %v434_v38 = vpop.permute.xlu0 %433 }
 0x312   : > { %436 = vst.msk [vmem:[#allocation2] sm:$0x3] %vm425_vm4, %v434_v38  ;;  %v925_v38 = vld [vmem:[%s1456_s16 + $0x6] sm:$0x3]  ;;  %s726_s16 = sadd.s32 3, %s1509_s29 }
 0x315   : > { %v501_v54 = vpop.permute.xlu1 %500 }
 0x319   : > { %v443_v39 = vld [vmem:[#allocation2] sm:$0x3] }
 0x31a   : > { %v447_v40 = vpack.c.bf16 %v443_v39, %v443_v39 }
 0x31c   : > { %966 = vmatmul.mubr.msk.bf16.vlgmr.msra.gmra.mxu1 %vm345_vm2, %v447_v40 }
 0x31d   : > { %978 = vmatpush3.bf16.msra.mxu1 %v1476_v2  ;;  %981 = vmatprep.mubr.msk.bf16.mxu1 %vm1286_vm1, %v1285_v3 }
 0x31e   : > { %979 = vmatprep.subr.bf16.mxu1 %v1285_v3 }
 0x321   : > { %980 = vmatpush3.bf16.msra.mxu1 %v1481_v4 }
 0x3dc   : > { %v485_v42 = vpop.f32.mrf.mxu1 }
 0x3dd   : > { %v491_v43 = vadd.f32 %v917_v41, %v485_v42 }
 0x3de   : > { %v967_v44 = vpop.f32.mrf.mxu1 }
 0x3df   : > { %1079 = vtanh.f32 %v491_v43  ;;  %v919_v48 = vmul.f32 -1.442695, %v491_v43 }
 0x3e0   : > { %v488_v45 = vpop.f32.mrf.mxu1 }
 0x3e1   : > { %1081 = vpow2.f32 %v919_v48 }
 0x3e2   : > { %v968_v46 = vpop.f32.mrf.mxu1 }
 0x3ec   : > { %v1080_v47 = vpop.eup %1079 }
 0x3ed   : > { %505 = vrot.lane.b32.xlu0 %v1080_v47, %s1288_s30 }
 0x3ee   : > { %v1082_v49 = vpop.eup %1081 }
 0x3ef   : > { %v495_v50 = vadd.f32 1.0, %v1082_v49 }
 0x3f1   : > { %1083 = vrcp.f32 %v495_v50 }
 0x3fe   : > { %v1084_v51 = vpop.eup %1083 }
 0x3ff   : > { %v503_v55 = vmul.f32 %v1084_v51, %v501_v54 }
 0x45f   : > { %v506_v52 = vpop.permute.xlu0 %505 }
 0x460   : > { %v508_v53 = vmul.f32 %v1084_v51, %v506_v52 }
 0x462   : > { %510 = vrot.lane.b32.xlu0 %v508_v53, %s1289_s23 }
 0x466   : > { %530 = vrot.lane.b32.xlu0 %v443_v39, %s1290_s18 }
 0x4d4   : > { %v511_v57 = vpop.permute.xlu0 %510 }
 0x4d5   : > { %v513_v58 = vadd.f32 %v511_v57, %v503_v55 }
 0x4d7   : > { %1085 = vtanh.f32 %v513_v58  ;;  %v523_v59 = vsel %vm522_vm5, %v513_v58, %v501_v54  ;;  %v727_v54 = vstv %s726_s16 }
 0x4d8   : > { %525 = vrot.lane.b32.xlu0 %v523_v59, %s1290_s18  ;;  %v531_v61 = vpop.permute.xlu0 %530  ;;  %vm728_vm7 = vcmp.lt.s32.totalorder %v727_v54, %v1512_v28 }
 0x4e4   : > { %v1086_v60 = vpop.eup %1085 }
 0x4e5   : > { %516 = vrot.lane.b32.xlu1 %v1086_v60, %s1288_s30 }
 0x54a   : > { %v526_v62 = vpop.permute.xlu0 %525 }
 0x54b   : > { %528 = vst.msk [vmem:[#allocation3] sm:$0x3] %vm425_vm4, %v526_v62 }
 0x552   : > { %v547_v63 = vld [vmem:[#allocation3] sm:$0x3] }
 0x553   : > { %603 = vrot.lane.b32.xlu0 %v547_v63, %s1289_s23 }
 0x557   : > { %v517_v0 = vpop.permute.xlu1 %516 }
 0x558   : > { %v1554_v1 = vmul.f32 %v1084_v51, %v517_v0 }
 0x55a   : > { %v533_v2 = vsel %vm522_vm5, %v1554_v1, %v531_v61  ;;  %v539_v51 = vsel %vm522_vm5, %v1554_v1, 0.0  ;;  %v437_v61 = vsel %vm1515_vm3, %v1524_v35, 0.0 }
 0x55b   : > { %535 = vrot.lane.b32.xlu1 %v533_v2, %s1289_s23 }
 0x5c5   : > { %v604_v19 = vpop.permute.xlu0 %603 }
 0x5cd   : > { %v536_v3 = vpop.permute.xlu1 %535 }
 0x5ce   : > { %538 = vst.msk [vmem:[#allocation2] sm:$0x3] %vm425_vm4, %v536_v3 }
 0x5d5   : > { %v546_v4 = vld [vmem:[#allocation2] sm:$0x3] }
 0x5d6   : > { %v550_v5 = vpack.c.bf16 %v546_v4, %v546_v4 }
 0x5d8   : > { %974 = vmatmul.mubr.msk.bf16.vlgmr.msra.gmra.mxu0 %vm345_vm2, %v550_v5 }
 0x698   : > { %v588_v7 = vpop.f32.mrf.mxu0 }
 0x699   : > { %v594_v8 = vadd.f32 %v921_v6, %v588_v7 }
 0x69a   : > { %v975_v9 = vpop.f32.mrf.mxu0 }
 0x69b   : > { %1087 = vtanh.f32 %v594_v8  ;;  %v923_v13 = vmul.f32 -1.442695, %v594_v8 }
 0x69c   : > { %v591_v10 = vpop.f32.mrf.mxu0 }
 0x69d   : > { %1089 = vpow2.f32 %v923_v13 }
 0x69e   : > { %v976_v11 = vpop.f32.mrf.mxu0 }
 0x6a8   : > { %v1088_v12 = vpop.eup %1087 }
 0x6a9   : > { %608 = vrot.lane.b32.xlu1 %v1088_v12, %s1288_s30 }
 0x6aa   : > { %v1090_v14 = vpop.eup %1089 }
 0x6ab   : > { %v598_v15 = vadd.f32 1.0, %v1090_v14 }
 0x6ad   : > { %1091 = vrcp.f32 %v598_v15 }
 0x6ba   : > { %v1092_v16 = vpop.eup %1091 }
 0x6bb   : > { %v606_v20 = vmul.f32 %v1092_v16, %v604_v19 }
 0x71b   : > { %v609_v17 = vpop.permute.xlu1 %608 }
 0x71c   : > { %v611_v18 = vmul.f32 %v1092_v16, %v609_v17 }
 0x71e   : > { %613 = vrot.lane.b32.xlu1 %v611_v18, %s1289_s23 }
 0x722   : > { %633 = vrot.lane.b32.xlu1 %v546_v4, %s1290_s18 }
 0x790   : > { %v614_v22 = vpop.permute.xlu1 %613 }
 0x791   : > { %v616_v23 = vadd.f32 %v614_v22, %v606_v20 }
 0x793   : > { %1093 = vtanh.f32 %v616_v23  ;;  %v626_v24 = vsel %vm625_vm6, %v616_v23, %v604_v19 }
 0x794   : > { %628 = vrot.lane.b32.xlu1 %v626_v24, %s1290_s18  ;;  %v634_v26 = vpop.permute.xlu1 %633 }
 0x7a0   : > { %v1094_v25 = vpop.eup %1093 }
 0x7a1   : > { %619 = vrot.lane.b32.xlu0 %v1094_v25, %s1288_s30 }
 0x806   : > { %v629_v27 = vpop.permute.xlu1 %628 }
 0x807   : > { %631 = vst.msk [vmem:[#allocation3] sm:$0x3] %vm425_vm4, %v629_v27 }
 0x80e   : > { %v650_v30 = vld [vmem:[#allocation3] sm:$0x3] }
 0x80f   : > { %706 = vrot.lane.b32.xlu1 %v650_v30, %s1289_s23 }
 0x813   : > { %v620_v31 = vpop.permute.xlu0 %619 }
 0x814   : > { %v622_v32 = vmul.f32 %v1092_v16, %v620_v31 }
 0x816   : > { %v636_v33 = vsel %vm625_vm6, %v622_v32, %v634_v26  ;;  %v642_v62 = vsel %vm625_vm6, %v622_v32, 0.0 }
 0x817   : > { %638 = vrot.lane.b32.xlu0 %v636_v33, %s1289_s23 }
 0x881   : > { %v707_v52 = vpop.permute.xlu1 %706 }
 0x889   : > { %v639_v34 = vpop.permute.xlu0 %638 }
 0x88a   : > { %641 = vst.msk [vmem:[#allocation2] sm:$0x3] %vm425_vm4, %v639_v34 }
 0x891   : > { %v649_v36 = vld [vmem:[#allocation2] sm:$0x3] }
 0x892   : > { %v653_v37 = vpack.c.bf16 %v649_v36, %v649_v36 }
 0x894   : > { %982 = vmatmul.mubr.msk.bf16.vlgmr.msra.gmra.mxu1 %vm345_vm2, %v653_v37 }
 0x954   : > { %v691_v39 = vpop.f32.mrf.mxu1 }
 0x955   : > { %v697_v40 = vadd.f32 %v925_v38, %v691_v39 }
 0x956   : > { %v983_v41 = vpop.f32.mrf.mxu1 }
 0x957   : > { %1095 = vtanh.f32 %v697_v40  ;;  %v927_v45 = vmul.f32 -1.442695, %v697_v40 }
 0x958   : > { %v694_v42 = vpop.f32.mrf.mxu1 }
 0x959   : > { %1097 = vpow2.f32 %v927_v45 }
 0x95a   : > { %v984_v43 = vpop.f32.mrf.mxu1 }
 0x964   : > { %v1096_v44 = vpop.eup %1095 }
 0x965   : > { %711 = vrot.lane.b32.xlu0 %v1096_v44, %s1288_s30 }
 0x966   : > { %v1098_v46 = vpop.eup %1097 }
 0x967   : > { %v701_v47 = vadd.f32 1.0, %v1098_v46 }
 0x969   : > { %1099 = vrcp.f32 %v701_v47 }
 0x976   : > { %v1100_v48 = vpop.eup %1099 }
 0x977   : > { %v709_v53 = vmul.f32 %v1100_v48, %v707_v52 }
 0x9d7   : > { %v712_v49 = vpop.permute.xlu0 %711 }
 0x9d8   : > { %v714_v50 = vmul.f32 %v1100_v48, %v712_v49 }
 0x9da   : > { %716 = vrot.lane.b32.xlu0 %v714_v50, %s1289_s23 }
 0x9de   : > { %736 = vrot.lane.b32.xlu0 %v649_v36, %s1290_s18 }
 0x9e2   : > { %541 = vrot.lane.b32.xlu0 %v539_v51, %s1289_s23 }
 0xa4c   : > { %v717_v55 = vpop.permute.xlu0 %716 }
 0xa4d   : > { %v719_v57 = vadd.f32 %v717_v55, %v709_v53 }
 0xa4f   : > { %1101 = vtanh.f32 %v719_v57  ;;  %v729_v58 = vsel %vm728_vm7, %v719_v57, %v707_v52 }
 0xa50   : > { %v737_v59 = vpop.permute.xlu0 %736  ;;  %731 = vrot.lane.b32.xlu0 %v729_v58, %s1290_s18 }
 0xa54   : > { %v542_v60 = vpop.permute.xlu0 %541 }
 0xa55   : > { %920 = vst.msk [vmem:[%s1466_s9 + $0x2] sm:$0x3] %vm425_vm4, %v542_v60 }
 0xa5c   : > { %v1102_v56 = vpop.eup %1101 }
 0xa5d   : > { %722 = vrot.lane.b32.xlu1 %v1102_v56, %s1288_s30 }
 0xa61   : > { %439 = vrot.lane.b32.xlu1 %v437_v61, %s1289_s23 }
 0xa65   : > { %644 = vrot.lane.b32.xlu1 %v642_v62, %s1289_s23 }
 0xac2   : > { %v732_v63 = vpop.permute.xlu0 %731 }
 0xac3   : > { %734 = vst.msk [vmem:[#allocation3] sm:$0x3] %vm425_vm4, %v732_v63 }
 0xacf   : > { %v723_v0 = vpop.permute.xlu1 %722 }
 0xad0   : > { %v725_v1 = vmul.f32 %v1100_v48, %v723_v0 }
 0xad2   : > { %v745_v2 = vsel %vm728_vm7, %v725_v1, 0.0  ;;  %v739_v29 = vsel %vm728_vm7, %v725_v1, %v737_v59 }
 0xad3   : > { %747 = vrot.lane.b32.xlu0 %v745_v2, %s1289_s23  ;;  %741 = vrot.lane.b32.xlu1 %v739_v29, %s1289_s23  ;;  %v440_v35 = vpop.permute.xlu1 %439 }
 0xad4   : > { %442 = vst.msk [vmem:[%s1466_s9] sm:$0x3] %vm425_vm4, %v440_v35 }
 0xad7   : > { %v645_v3 = vpop.permute.xlu1 %644 }
 0xad8   : > { %924 = vst.msk [vmem:[%s1466_s9 + $0x4] sm:$0x3] %vm425_vm4, %v645_v3 }
 0xb42   : > { %755 = sbr.rel (%p929_p12) target bundleno = 2895 (0xb4f), region = 56 }
 0xb45   : > { %v748_v4 = vpop.permute.xlu0 %747  ;;  %v742_v5 = vpop.permute.xlu1 %741 }
 0xb46   : > { %928 = vst.msk [vmem:[%s1466_s9 + $0x6] sm:$0x3] %vm425_vm4, %v748_v4  ;;  %744 = vst.msk [vmem:[#allocation2] sm:$0x3] %vm425_vm4, %v742_v5 }
 0xb47   : > { %v758_v6 = vld [vmem:[#allocation3] sm:$0x3] }
 0xb48   : > { %759 = vst.msk [vmem:[#allocation12] sm:$0x3] %vm425_vm4, %v758_v6 }
 0xb4d   : > { %v756_v28 = vld [vmem:[#allocation2] sm:$0x3] }
 0xb4e   : > { %757 = vst.msk [vmem:[#allocation10] sm:$0x3] %vm425_vm4, %v756_v28 }
 0xb4f PF: > { %s1291_s19 = smov [#allocation10]   ;;  %s940_s15 = sshll.u32 %s1356_s28, 7 }
 0xb50   : > { %s788_s14 = sshll.u32 %s1291_s19, 4  ;;  %s1625_s11 = scalar_lea.hbm %s1696_s5, %s940_s15  ;;  %s789_s14 = int_to_ptr.vmem [resolvable:$true] %s788_s14 }
 0xb51   : > { %s1157_s20 = scalar_lea.vmem %s789_s14, 32  ;;  %p1719_p8 = scmp.eq.s32.totalorder %s1356_s28, 1 }
 0xb52   : > { %p1158_p7 = scmp.ne.s32.totalorder %s789_s14, %s1157_s20  ;;  %p1164_p13 = scmp.lt.s32.totalorder %s789_s14, %s789_s14 }
 0xb53   : > { %p1165_p0 = scmp.lt.s32.totalorder %s1157_s20, %s1157_s20 }
 0xb54   : > { %p1159_p11 = pnand %p1158_p7, %p1719_p8 }
 0xb55   : > { %p1166_p5 = por %p1165_p0, %p1164_p13 }
 0xb56   : > { %p1160_p2 = pneg %p1159_p11 }
 0xb58   : > { %p1167_p10 = pnand %p1166_p5, %p1160_p2 }
 0xb5a   : > { %1170 = shalt.err (!%p1167_p10)
}
 0xb5b   : > { %p1720_p1 = pmov %p1719_p8  ;;  %s774_s2 = sshll.u32 %s1466_s9, 4  ;;  %s1635_s2 = int_to_ptr.vmem [resolvable:$true] %s774_s2 }
 0xb5c   : > { %s761_s12 = scalar_lea.sflag [#allocation6], %s1452_s10  ;;  %s1181_s16 = scalar_lea.vmem %s1635_s2, 128 }
 0xb5d   : > { %993 = dma.vmem_to_hbm [thread:$0]  (%p1720_p1), %s789_s14, 32, %s1697_s6, [#allocation11]  }
 0xb5e   : > { %p1182_p4 = scmp.ne.s32.totalorder %s1635_s2, %s1181_s16  ;;  %p1721_p6 = scmp.ne.s32.totalorder %s1710_s22, 0 }
 0xb5f   : > { %s1292_s19 = smov [#allocation9]  }
 0xb60   : > { %p1183_p9 = pnand %p1182_p4, %p1721_p6  ;;  %s1185_s15 = sshll.u32 %s1292_s19, 4  ;;  %s1186_s15 = int_to_ptr.vmem [resolvable:$false] %s1185_s15 }
 0xb61   : > { %s1187_s17 = scalar_lea.vmem %s1186_s15, 256  ;;  %p1188_p12 = scmp.lt.s32.totalorder %s1635_s2, %s1186_s15 }
 0xb62   : > { %p1184_p3 = pneg %p1183_p9  ;;  %p1189_p7 = scmp.lt.s32.totalorder %s1187_s17, %s1181_s16 }
 0xb64   : > { %p1190_p8 = por %p1189_p7, %p1188_p12 }
 0xb66   : > { %p1191_p11 = pnand %p1190_p8, %p1184_p3 }
 0xb68   : > { %1194 = shalt.err (!%p1191_p11)
}
 0xb69   : > { %s1195_s9 = scalar_lea.hbm %s1625_s11, 128  ;;  %s1199_s20 = scalar_lea.hbm %s1696_s5, 256 }
 0xb6a   : > { %p1196_p2 = scmp.ne.s32.totalorder %s1625_s11, %s1195_s9  ;;  %p1200_p5 = scmp.lt.s32.totalorder %s1625_s11, %s1696_s5 }
 0xb6b   : > { %p1201_p10 = scmp.lt.s32.totalorder %s1199_s20, %s1195_s9 }
 0xb6c   : > { %p1197_p13 = pnand %p1196_p2, %p1721_p6 }
 0xb6d   : > { %p1202_p1 = por %p1201_p10, %p1200_p5 }
 0xb6e   : > { %p1198_p0 = pneg %p1197_p13 }
 0xb70   : > { %p1203_p4 = pnand %p1202_p1, %p1198_p0 }
 0xb72   : > { %1206 = shalt.err (!%p1203_p4)
}
 0xb73   : > { %s1293_s16 = smov 2   ;;  %s1294_s19 = smov [#allocation12]  }
 0xb74   : > { %991 = dma.vmem_to_hbm [thread:$0]  (%p1721_p6), %s1635_s2, 128, %s1625_s11, %s761_s12, %s1289_s23, %s1289_s23, %s1293_s16  }
 0xb75   : > { %s799_s15 = sshll.u32 %s1294_s19, 4  ;;  %p1722_p3 = scmp.eq.s32.totalorder %s1356_s28, 1  ;;  %s800_s15 = int_to_ptr.vmem [resolvable:$true] %s799_s15 }
 0xb76   : > { %s1207_s17 = scalar_lea.vmem %s800_s15, 32  ;;  %p1214_p8 = scmp.lt.s32.totalorder %s800_s15, %s800_s15 }
 0xb77   : > { %p1208_p9 = scmp.ne.s32.totalorder %s800_s15, %s1207_s17  ;;  %p1215_p11 = scmp.lt.s32.totalorder %s1207_s17, %s1207_s17 }
 0xb79   : > { %p1209_p12 = pnand %p1208_p9, %p1722_p3  ;;  %p1216_p2 = por %p1215_p11, %p1214_p8 }
 0xb7b   : > { %p1210_p7 = pneg %p1209_p12 }
 0xb7d   : > { %p1217_p13 = pnand %p1216_p2, %p1210_p7 }
 0xb7f   : > { %1220 = shalt.err (!%p1217_p13)
}
 0xb80   : > { %p1723_p0 = pmov %p1722_p3 }
 0xb82   : > { %995 = dma.vmem_to_hbm [thread:$0]  (%p1723_p0), %s800_s15, 32, %s1698_s7, [#allocation11]  }
 0xb83   : > { %p1724_p6 = pmov %p1723_p0 }
 0xb84   : > { %p1725_p5 = pmov %p1723_p0 }
 0xb85   : > { %1256 = dma.done.wait (%p1724_p6), [#allocation11], 64  }
 0xb86   : > { %1258 = vsyncadd (%p1725_p5), [#allocation11], 4294967232 }
 0xb87 PF: > { %s819_s23 = sand.u32 1, %s1265_s24   ;;  %p1726_p10 = scmp.ne.s32.totalorder %s1705_s8, 0 }
 0xb88   : > { %p1727_p1 = scmp.ge.s32.totalorder %s1277_s27, 2  ;;  %s820_s11 = scalar_lea.sflag [#allocation6], %s819_s23 }
 0xb8a   : > { %p1010_p4 = pnand %p1727_p1, %p1726_p10 }
 0xb8c   : > { %p1011_p9 = pneg %p1010_p4 }
 0xb8e   : > { %1260 = dma.done.wait (%p1011_p9), %s820_s11, 128  }
 0xb8f   : > { %1262 = vsyncadd (%p1011_p9), %s820_s11, 4294967168  ;;  %p23_p3 = scmp.ge.s32.totalorder %s1390_s13, 4   ;;  %s1728_s24 = smov %s1269_s25 }
 0xb90   : > { %s1729_s25 = smov %s1273_s26  ;;  %s1730_s26 = smov %s1407_s21 }
 0xb91   : > { %s1731_s27 = smov %s1390_s13  ;;  %25 = sbr.rel (!%p23_p3) target bundleno = 9 (0x9), region = 119 }
 0xb96   :  { %825 = vsyncpa [#allocation5], 1 }
 0xb97   :  { %827 = vsyncpa [#allocation5 + $0x1], 1 }
 0xb98   :  { %828 = vsyncpa [#allocation8], 1 }
 0xb99   :  { %829 = vsyncpa [#allocation6], 1 }
 0xb9a   :  { %831 = vsyncpa [#allocation6 + $0x1], 1 }
 0xb9b   :  { %832 = vsyncpa [#allocation11], 1 }

</bundles_post_ra>
